<compile_context>
chip_gen: v6e
topology: v6e:2x2x1
jax: 0.10.0
libtpu: 0.0.40
codegen_flags: <defaults>
</compile_context>

<pallas_src>
import functools

import jax
import jax.numpy as jnp
from jax.experimental import pallas as pl
from jax.experimental.pallas import tpu as pltpu


def _round_up(x, m):
    return ((x + m - 1) // m) * m


def _edge_mlp_kernel(s_ref, t_ref, e_ref,
                     w1s_ref, w1t_ref, w1e_ref, b1_ref,
                     w2_ref, b2_ref, o_ref):
    # ---- layer 1: fused concat + Linear + ReLU -------------------------------
    # cat([s, t, e], 1) @ W1  ==  s @ W1[:ds] + t @ W1[ds:ds+dt] + e @ W1[ds+dt:]
    # Activations arrive as f32; cast to bf16 here (VPU slack) for the MXU.
    h = jnp.dot(s_ref[...].astype(jnp.bfloat16), w1s_ref[...],
                preferred_element_type=jnp.float32)
    h = h + jnp.dot(t_ref[...].astype(jnp.bfloat16), w1t_ref[...],
                    preferred_element_type=jnp.float32)
    h = h + jnp.dot(e_ref[...].astype(jnp.bfloat16), w1e_ref[...],
                    preferred_element_type=jnp.float32)
    h = jnp.maximum(h + b1_ref[...], 0.0)            # f32 VPU epilogue (v5e-safe)

    # ---- layer 2: Linear + ReLU ----------------------------------------------
    # Output kept at the logical width d_out: masked vst, but 8x fewer HBM bytes
    # than padding to 128 f32 lanes, and no post-kernel slice.
    y = jnp.dot(h.astype(jnp.bfloat16), w2_ref[...],
                preferred_element_type=jnp.float32)
    y = jnp.maximum(y + b2_ref[...], 0.0)
    o_ref[...] = y.astype(o_ref.dtype)


def _choose_row_tile(N, max_tm):
    """Row tile with bounded padding; >=2 grid steps for large N (v7x megacore)."""
    min_steps = 2 if N > 512 else 1
    steps = max(pl.cdiv(N, max_tm), min_steps)
    return _round_up(pl.cdiv(N, steps), 8)


@functools.partial(jax.jit, static_argnames=("max_tm",))
def edge_model_pallas(source, target, edge_attr,
                      w1s, w1t, w1e, b1, w2, b2, *, max_tm=2048):
    """Fused EdgeModel forward: relu(relu(cat([s,t,e],1) @ W1 + b1) @ W2 + b2).

    source:    [N, d_s]  f32      target: [N, d_t]  f32     edge_attr: [N, d_e] f32
    w1s/w1t/w1e: bf16 row-splits of W1, hidden dim pre-padded to a 128 multiple
    b1: [1, d_h_p] f32   w2: [d_h_p, d_out] bf16   b2: [1, d_out] f32
    Returns [N, d_out] float32.
    """
    N, d_s = source.shape
    d_t = target.shape[1]
    d_e = edge_attr.shape[1]
    d_h_p = w1s.shape[1]
    d_out = w2.shape[1]

    tm = _choose_row_tile(N, max_tm)
    grid = (pl.cdiv(N, tm),)          # ragged last block: OOB reads don't-care, writes masked

    return pl.pallas_call(
        _edge_mlp_kernel,
        out_shape=jax.ShapeDtypeStruct((N, d_out), jnp.float32),
        grid_spec=pltpu.PrefetchScalarGridSpec(
            num_scalar_prefetch=0,
            grid=grid,
            in_specs=[
                pl.BlockSpec((tm, d_s), lambda i: (i, 0)),        # source tile (f32)
                pl.BlockSpec((tm, d_t), lambda i: (i, 0)),        # target tile (f32)
                pl.BlockSpec((tm, d_e), lambda i: (i, 0)),        # edge_attr tile (f32)
                pl.BlockSpec((d_s, d_h_p), lambda i: (0, 0)),     # W1 rows for source (bf16)
                pl.BlockSpec((d_t, d_h_p), lambda i: (0, 0)),     # W1 rows for target (bf16)
                pl.BlockSpec((d_e, d_h_p), lambda i: (0, 0)),     # W1 rows for edge (bf16)
                pl.BlockSpec((1, d_h_p), lambda i: (0, 0)),       # b1 (f32)
                pl.BlockSpec((d_h_p, d_out), lambda i: (0, 0)),   # W2 (bf16)
                pl.BlockSpec((1, d_out), lambda i: (0, 0)),       # b2 (f32)
            ],
            out_specs=pl.BlockSpec((tm, d_out), lambda i: (i, 0)),
        ),
        compiler_params=pltpu.CompilerParams(
            dimension_semantics=("parallel",),     # multi-step grids shard over v7x's 2 TCs
            vmem_limit_bytes=32 * 1024 * 1024,
        ),
    )(source, target, edge_attr, w1s, w1t, w1e, b1, w2, b2)


def _init_linear(key, d_in, d_out, dtype=jnp.float32):
    """Deterministic PyTorch-Linear-style init; weight pre-transposed to [d_in, d_out]."""
    kw, kb = jax.random.split(key)
    bound = 1.0 / jnp.sqrt(jnp.asarray(d_in, dtype))
    w = jax.random.uniform(kw, (d_in, d_out), dtype, -bound, bound)
    b = jax.random.uniform(kb, (d_out,), dtype, -bound, bound)
    return w, b


class EdgeModelPallas:
    """JAX/Pallas re-implementation of EdgeModel with a 2-layer (Linear+ReLU) edge MLP."""

    def __init__(self, key, d_node, d_edge, d_hidden, d_out):
        k1, k2 = jax.random.split(key)
        d_in = 2 * d_node + d_edge                 # cat([source, target, edge_attr], 1)
        self.w1, self.b1 = _init_linear(k1, d_in, d_hidden)
        self.w2, self.b2 = _init_linear(k2, d_hidden, d_out)

        # One-time weight prep (hoisted out of the per-call path): hidden dim
        # zero-padded to a 128 multiple, W1 split row-wise so the concat is fused,
        # MXU operands pre-cast to bf16, biases kept f32.
        d_h_p = _round_up(d_hidden, 128)
        w1_p = jnp.pad(self.w1, ((0, 0), (0, d_h_p - d_hidden))).astype(jnp.bfloat16)
        self.w1s = w1_p[:d_node]
        self.w1t = w1_p[d_node:2 * d_node]
        self.w1e = w1_p[2 * d_node:]
        self.b1_p = jnp.pad(self.b1, (0, d_h_p - d_hidden)).astype(jnp.float32)[None, :]
        self.w2_p = jnp.pad(self.w2, ((0, d_h_p - d_hidden), (0, 0))).astype(jnp.bfloat16)
        self.b2_p = self.b2.astype(jnp.float32)[None, :]

    def __call__(self, source, target, edge_attr):
        return edge_model_pallas(source, target, edge_attr,
                                 self.w1s, self.w1t, self.w1e, self.b1_p,
                                 self.w2_p, self.b2_p)


def _edge_model_ref(source, target, edge_attr, w1, b1, w2, b2):
    """Pure-JAX reference with the same bf16-in / f32-accumulate matmul precision."""
    x = jnp.concatenate([source, target, edge_attr], axis=1)
    h = jnp.dot(x.astype(jnp.bfloat16), w1.astype(jnp.bfloat16),
                preferred_element_type=jnp.float32) + b1
    h = jnp.maximum(h, 0.0)
    y = jnp.dot(h.astype(jnp.bfloat16), w2.astype(jnp.bfloat16),
                preferred_element_type=jnp.float32) + b2
    return jnp.maximum(y, 0.0)


if __name__ == "__main__":
    key = jax.random.PRNGKey(0)
    k_params, k_src, k_tgt, k_edge = jax.random.split(key, 4)

    # Small shapes consistent with the MOT message-passing edge update:
    #   node embedding dim 32, edge embedding dim 16, hidden 80, edge out 16.
    #   num_edges intentionally NOT a multiple of 8 to exercise the ragged block.
    num_edges = 203
    d_node, d_edge, d_hidden, d_out = 32, 16, 80, 16

    source = jax.random.normal(k_src, (num_edges, d_node), jnp.float32)
    target = jax.random.normal(k_tgt, (num_edges, d_node), jnp.float32)
    edge_attr = jax.random.normal(k_edge, (num_edges, d_edge), jnp.float32)

    model = EdgeModelPallas(k_params, d_node=d_node, d_edge=d_edge,
                            d_hidden=d_hidden, d_out=d_out)

    out = model(source, target, edge_attr)
    jax.block_until_ready(out)

    # Correctness check vs pure-JAX reference of the same math.
    ref = _edge_model_ref(source, target, edge_attr,
                          model.w1, model.b1, model.w2, model.b2)
    assert out.shape == (num_edges, d_out)
    assert jnp.allclose(out, ref, atol=2e-2, rtol=2e-2), float(jnp.max(jnp.abs(out - ref)))

    print("KERNEL_OK")
</pallas_src>

<mosaic_0001>
module attributes {stable_mosaic.version = 11 : i64} {
  func.func @_edge_mlp_kernel(%arg0: i32, %arg1: memref<208x32xf32, #tpu.memory_space<vmem>>, %arg2: memref<208x32xf32, #tpu.memory_space<vmem>>, %arg3: memref<208x16xf32, #tpu.memory_space<vmem>>, %arg4: memref<32x128xbf16, #tpu.memory_space<vmem>>, %arg5: memref<32x128xbf16, #tpu.memory_space<vmem>>, %arg6: memref<16x128xbf16, #tpu.memory_space<vmem>>, %arg7: memref<1x128xf32, #tpu.memory_space<vmem>>, %arg8: memref<128x16xbf16, #tpu.memory_space<vmem>>, %arg9: memref<1x16xf32, #tpu.memory_space<vmem>>, %arg10: memref<208x16xf32, #tpu.memory_space<vmem>>) attributes {dimension_semantics = [#tpu.dimension_semantics<parallel>], iteration_bounds = array<i64: 1>, scalar_prefetch = 0 : i64, scratch_operands = 0 : i64, tpu.core_type = #tpu.core_type<tc>, window_params = [{transform_indices = @transform_0, window_bounds = array<i64: 208, 32>}, {transform_indices = @transform_1, window_bounds = array<i64: 208, 32>}, {transform_indices = @transform_2, window_bounds = array<i64: 208, 16>}, {pipeline_mode = #tpu.pipeline_mode<synchronous>, transform_indices = @transform_3, window_bounds = array<i64: 32, 128>}, {pipeline_mode = #tpu.pipeline_mode<synchronous>, transform_indices = @transform_4, window_bounds = array<i64: 32, 128>}, {pipeline_mode = #tpu.pipeline_mode<synchronous>, transform_indices = @transform_5, window_bounds = array<i64: 16, 128>}, {pipeline_mode = #tpu.pipeline_mode<synchronous>, transform_indices = @transform_6, window_bounds = array<i64: 1, 128>}, {pipeline_mode = #tpu.pipeline_mode<synchronous>, transform_indices = @transform_7, window_bounds = array<i64: 128, 16>}, {pipeline_mode = #tpu.pipeline_mode<synchronous>, transform_indices = @transform_8, window_bounds = array<i64: 1, 16>}, {transform_indices = @transform_9, window_bounds = array<i64: 208, 16>}]} {
    %c0 = arith.constant 0 : index
    %c0_0 = arith.constant 0 : index
    %0 = vector.load %arg1[%c0, %c0_0] : memref<208x32xf32, #tpu.memory_space<vmem>>, vector<208x32xf32>
    %1 = arith.truncf %0 : vector<208x32xf32> to vector<208x32xbf16>
    %c0_1 = arith.constant 0 : index
    %c0_2 = arith.constant 0 : index
    %2 = vector.load %arg4[%c0_1, %c0_2] : memref<32x128xbf16, #tpu.memory_space<vmem>>, vector<32x128xbf16>
    %cst = arith.constant dense<0.000000e+00> : vector<208x128xf32>
    %3 = tpu.matmul %1, %2, %cst {dimension_numbers = #tpu.dot_dimension_numbers<[1], [0], [0], [1], [0, 0, 1, 1], [], []>} : vector<208x32xbf16>, vector<32x128xbf16>, vector<208x128xf32> -> vector<208x128xf32>
    %c0_3 = arith.constant 0 : index
    %c0_4 = arith.constant 0 : index
    %4 = vector.load %arg2[%c0_3, %c0_4] : memref<208x32xf32, #tpu.memory_space<vmem>>, vector<208x32xf32>
    %5 = arith.truncf %4 : vector<208x32xf32> to vector<208x32xbf16>
    %c0_5 = arith.constant 0 : index
    %c0_6 = arith.constant 0 : index
    %6 = vector.load %arg5[%c0_5, %c0_6] : memref<32x128xbf16, #tpu.memory_space<vmem>>, vector<32x128xbf16>
    %cst_7 = arith.constant dense<0.000000e+00> : vector<208x128xf32>
    %7 = tpu.matmul %5, %6, %cst_7 {dimension_numbers = #tpu.dot_dimension_numbers<[1], [0], [0], [1], [0, 0, 1, 1], [], []>} : vector<208x32xbf16>, vector<32x128xbf16>, vector<208x128xf32> -> vector<208x128xf32>
    %8 = arith.addf %3, %7 : vector<208x128xf32>
    %c0_8 = arith.constant 0 : index
    %c0_9 = arith.constant 0 : index
    %9 = vector.load %arg3[%c0_8, %c0_9] : memref<208x16xf32, #tpu.memory_space<vmem>>, vector<208x16xf32>
    %10 = arith.truncf %9 : vector<208x16xf32> to vector<208x16xbf16>
    %c0_10 = arith.constant 0 : index
    %c0_11 = arith.constant 0 : index
    %11 = vector.load %arg6[%c0_10, %c0_11] : memref<16x128xbf16, #tpu.memory_space<vmem>>, vector<16x128xbf16>
    %cst_12 = arith.constant dense<0.000000e+00> : vector<208x128xf32>
    %12 = tpu.matmul %10, %11, %cst_12 {dimension_numbers = #tpu.dot_dimension_numbers<[1], [0], [0], [1], [0, 0, 1, 1], [], []>} : vector<208x16xbf16>, vector<16x128xbf16>, vector<208x128xf32> -> vector<208x128xf32>
    %13 = arith.addf %8, %12 : vector<208x128xf32>
    %c0_13 = arith.constant 0 : index
    %c0_14 = arith.constant 0 : index
    %14 = vector.load %arg7[%c0_13, %c0_14] : memref<1x128xf32, #tpu.memory_space<vmem>>, vector<1x128xf32>
    %15 = vector.broadcast %14 : vector<1x128xf32> to vector<208x128xf32>
    %16 = arith.addf %13, %15 : vector<208x128xf32>
    %cst_15 = arith.constant 0.000000e+00 : f32
    %17 = vector.broadcast %cst_15 : f32 to vector<208x128xf32>
    %18 = arith.maximumf %16, %17 : vector<208x128xf32>
    %19 = arith.truncf %18 : vector<208x128xf32> to vector<208x128xbf16>
    %c0_16 = arith.constant 0 : index
    %c0_17 = arith.constant 0 : index
    %20 = vector.load %arg8[%c0_16, %c0_17] : memref<128x16xbf16, #tpu.memory_space<vmem>>, vector<128x16xbf16>
    %cst_18 = arith.constant dense<0.000000e+00> : vector<208x16xf32>
    %21 = tpu.matmul %19, %20, %cst_18 {dimension_numbers = #tpu.dot_dimension_numbers<[1], [0], [0], [1], [0, 0, 1, 1], [], []>} : vector<208x128xbf16>, vector<128x16xbf16>, vector<208x16xf32> -> vector<208x16xf32>
    %c0_19 = arith.constant 0 : index
    %c0_20 = arith.constant 0 : index
    %22 = vector.load %arg9[%c0_19, %c0_20] : memref<1x16xf32, #tpu.memory_space<vmem>>, vector<1x16xf32>
    %23 = vector.broadcast %22 : vector<1x16xf32> to vector<208x16xf32>
    %24 = arith.addf %21, %23 : vector<208x16xf32>
    %cst_21 = arith.constant 0.000000e+00 : f32
    %25 = vector.broadcast %cst_21 : f32 to vector<208x16xf32>
    %26 = arith.maximumf %24, %25 : vector<208x16xf32>
    %c0_22 = arith.constant 0 : index
    %c0_23 = arith.constant 0 : index
    %27 = vector.load %arg10[%c0_22, %c0_23] : memref<208x16xf32, #tpu.memory_space<vmem>>, vector<208x16xf32>
    tpu.vector_store %arg10[%c0_22, %c0_23], %26 {strides = array<i32>} : memref<208x16xf32, #tpu.memory_space<vmem>>, vector<208x16xf32>,
    return
  }
  func.func @transform_0(%arg0: i32) -> (i32, i32) {
    %c0_i32 = arith.constant 0 : i32
    %c0_i32_0 = arith.constant 0 : i32
    return %arg0, %c0_i32 : i32, i32
  }
  func.func @transform_1(%arg0: i32) -> (i32, i32) {
    %c0_i32 = arith.constant 0 : i32
    %c0_i32_0 = arith.constant 0 : i32
    return %arg0, %c0_i32 : i32, i32
  }
  func.func @transform_2(%arg0: i32) -> (i32, i32) {
    %c0_i32 = arith.constant 0 : i32
    %c0_i32_0 = arith.constant 0 : i32
    return %arg0, %c0_i32 : i32, i32
  }
  func.func @transform_3(%arg0: i32) -> (i32, i32) {
    %c0_i32 = arith.constant 0 : i32
    %c0_i32_0 = arith.constant 0 : i32
    %c0_i32_1 = arith.constant 0 : i32
    return %c0_i32, %c0_i32_0 : i32, i32
  }
  func.func @transform_4(%arg0: i32) -> (i32, i32) {
    %c0_i32 = arith.constant 0 : i32
    %c0_i32_0 = arith.constant 0 : i32
    %c0_i32_1 = arith.constant 0 : i32
    return %c0_i32, %c0_i32_0 : i32, i32
  }
  func.func @transform_5(%arg0: i32) -> (i32, i32) {
    %c0_i32 = arith.constant 0 : i32
    %c0_i32_0 = arith.constant 0 : i32
    %c0_i32_1 = arith.constant 0 : i32
    return %c0_i32, %c0_i32_0 : i32, i32
  }
  func.func @transform_6(%arg0: i32) -> (i32, i32) {
    %c0_i32 = arith.constant 0 : i32
    %c0_i32_0 = arith.constant 0 : i32
    %c0_i32_1 = arith.constant 0 : i32
    return %c0_i32, %c0_i32_0 : i32, i32
  }
  func.func @transform_7(%arg0: i32) -> (i32, i32) {
    %c0_i32 = arith.constant 0 : i32
    %c0_i32_0 = arith.constant 0 : i32
    %c0_i32_1 = arith.constant 0 : i32
    return %c0_i32, %c0_i32_0 : i32, i32
  }
  func.func @transform_8(%arg0: i32) -> (i32, i32) {
    %c0_i32 = arith.constant 0 : i32
    %c0_i32_0 = arith.constant 0 : i32
    %c0_i32_1 = arith.constant 0 : i32
    return %c0_i32, %c0_i32_0 : i32, i32
  }
  func.func @transform_9(%arg0: i32) -> (i32, i32) {
    %c0_i32 = arith.constant 0 : i32
    %c0_i32_0 = arith.constant 0 : i32
    return %arg0, %c0_i32 : i32, i32
  }
}

</mosaic_0001>

<bundles_post_ra>
// kernel: edge_model_pallas.1
= control target key start
LH: loop header
LB: loop body
LE: loop exit
PB: predicated region body
PF: predicated region fallthrough
CT: control target
= control target key end

     0   :  { %v1450_v0 = vmov 0.0   ;;  %vm1451_vm0 = vmmov 0   ;;  %vm131_vm1 = vcmask 261120   ;;  %vm543_vm2 = vcmask 130048   ;;  %s2175_s4 = inlined_call_operand.vmem [shape: bf16[32,128], index: 4, kind: input, shape index: {}]   ;;  %s2176_s3 = inlined_call_operand.vmem [shape: bf16[32,128], index: 3, kind: input, shape index: {}]   ;;  %s2177_s1 = inlined_call_operand.vmem [shape: f32[203,32], index: 1, kind: input, shape index: {}]   ;;  %s2178_s0 = inlined_call_operand.vmem [shape: f32[203,32], index: 0, kind: input, shape index: {}]   ;;  %s2179_s5 = inlined_call_operand.vmem [shape: bf16[16,128], index: 5, kind: input, shape index: {}]   ;;  %s2180_s7 = inlined_call_operand.vmem [shape: bf16[128,16], index: 7, kind: input, shape index: {}]   ;;  %s2181_s2 = inlined_call_operand.vmem [shape: f32[203,16], index: 2, kind: input, shape index: {}]   ;;  %s2182_s6 = inlined_call_operand.vmem [shape: f32[1,128], index: 6, kind: input, shape index: {}]   ;;  %s2183_s8 = inlined_call_operand.vmem [shape: f32[1,16], index: 8, kind: input, shape index: {}]   ;;  %s2184_s9 = inlined_call_operand.vmem [shape: f32[203,16], index: 9, kind: output, shape index: {}]  }
   0x1   :  { %1201 = vmatprep.subr.bf16.mxu0 %v1450_v0  ;;  %1257 = vmatprep.subr.bf16.mxu1 %v1450_v0  ;;  %v1437_v1 = vld [vmem:[%s2175_s4 + $0x8] sm:$0xff]   ;;  %v1439_v3 = vld [vmem:[%s2175_s4] sm:$0xff]   ;;  %v78_v12 = vld [vmem:[%s2177_s1 + $0x10] sm:$0xff] }
   0x2   :  { %v1438_v2 = vld [vmem:[%s2176_s3 + $0x8] sm:$0xff]   ;;  %1205 = vmatprep.mubr.msk.bf16.mxu0 %vm1451_vm0, %v1450_v0  ;;  %1261 = vmatprep.mubr.msk.bf16.mxu1 %vm1451_vm0, %v1450_v0  ;;  %v1440_v4 = vld [vmem:[%s2176_s3] sm:$0xff]   ;;  %v79_v13 = vld [vmem:[%s2177_s1 + $0x18] sm:$0xff] }
   0x3   :  { %1202 = vmatpush3.bf16.msra.mxu0 %v1437_v1  ;;  %1258 = vmatpush3.bf16.msra.mxu1 %v1438_v2  ;;  %v76_v5 = vld [vmem:[%s2177_s1] sm:$0xff]  ;;  %v77_v6 = vld [vmem:[%s2177_s1 + $0x8] sm:$0xff]  ;;  %v35_v14 = vld [vmem:[%s2178_s0 + $0x10] sm:$0xff]  ;;  %v103_v16 = vpack.c.bf16 %v79_v13, %v78_v12 }
   0x4   :  { %1203 = vmatprep.subr.bf16.mxu0 %v1450_v0  ;;  %1259 = vmatprep.subr.bf16.mxu1 %v1450_v0  ;;  %v33_v7 = vld [vmem:[%s2178_s0] sm:$0xff]  ;;  %v102_v8 = vpack.c.bf16 %v77_v6, %v76_v5  ;;  %v34_v9 = vld [vmem:[%s2178_s0 + $0x8] sm:$0xff]  ;;  %v36_v15 = vld [vmem:[%s2178_s0 + $0x18] sm:$0xff] }
   0x5   :  { %v59_v10 = vpack.c.bf16 %v34_v9, %v33_v7  ;;  %v1441_v11 = vld [vmem:[%s2179_s5] sm:$0xff]   ;;  %v60_v17 = vpack.c.bf16 %v36_v15, %v35_v14  ;;  %v81_v19 = vld [vmem:[%s2177_s1 + $0x28] sm:$0xff]  ;;  %v82_v24 = vld [vmem:[%s2177_s1 + $0x30] sm:$0xff] }
   0x6   :  { %v80_v18 = vld [vmem:[%s2177_s1 + $0x20] sm:$0xff]  ;;  %v38_v21 = vld [vmem:[%s2178_s0 + $0x28] sm:$0xff]  ;;  %v83_v25 = vld [vmem:[%s2177_s1 + $0x38] sm:$0xff] }
   0x7   :  { %1204 = vmatpush3.bf16.msra.mxu0 %v1439_v3  ;;  %1260 = vmatpush3.bf16.msra.mxu1 %v1440_v4  ;;  %v37_v20 = vld [vmem:[%s2178_s0 + $0x20] sm:$0xff]  ;;  %v104_v22 = vpack.c.bf16 %v81_v19, %v80_v18  ;;  %v39_v26 = vld [vmem:[%s2178_s0 + $0x30] sm:$0xff]  ;;  %v40_v27 = vld [vmem:[%s2178_s0 + $0x38] sm:$0xff]  ;;  %v105_v28 = vpack.c.bf16 %v83_v25, %v82_v24 }
   0x8   :  { %1313 = vmatprep.subr.bf16.mxu0 %v1450_v0  ;;  %1367 = vmatprep.subr.bf16.mxu1 %v1450_v0  ;;  %v61_v23 = vpack.c.bf16 %v38_v21, %v37_v20  ;;  %v62_v29 = vpack.c.bf16 %v40_v27, %v39_v26  ;;  %v84_v30 = vld [vmem:[%s2177_s1 + $0x40] sm:$0xff]  ;;  %v85_v31 = vld [vmem:[%s2177_s1 + $0x48] sm:$0xff]  ;;  %v86_v36 = vld [vmem:[%s2177_s1 + $0x50] sm:$0xff] }
   0x9   :  { %v41_v32 = vld [vmem:[%s2178_s0 + $0x40] sm:$0xff]  ;;  %v42_v33 = vld [vmem:[%s2178_s0 + $0x48] sm:$0xff]  ;;  %v106_v34 = vpack.c.bf16 %v85_v31, %v84_v30  ;;  %v87_v37 = vld [vmem:[%s2177_s1 + $0x58] sm:$0xff] }
   0xa   :  { %1206 = vmatmul.mubr.msk.bf16.vlgmr.msra.gmra.mxu0 %vm131_vm1, %v102_v8  ;;  %1262 = vmatmul.mubr.msk.bf16.vlgmr.msra.gmra.mxu1 %vm131_vm1, %v59_v10  ;;  %v63_v35 = vpack.c.bf16 %v42_v33, %v41_v32  ;;  %v43_v38 = vld [vmem:[%s2178_s0 + $0x50] sm:$0xff]  ;;  %v44_v39 = vld [vmem:[%s2178_s0 + $0x58] sm:$0xff]  ;;  %v107_v40 = vpack.c.bf16 %v87_v37, %v86_v36  ;;  %v88_v42 = vld [vmem:[%s2177_s1 + $0x60] sm:$0xff] }
   0xb   :  { %1314 = vmatpush3.bf16.msra.mxu0 %v1441_v11  ;;  %1209 = vmatprep.mubr.msk.bf16.mxu0 %vm1451_vm0, %v1450_v0  ;;  %v64_v41 = vpack.c.bf16 %v44_v39, %v43_v38  ;;  %v89_v43 = vld [vmem:[%s2177_s1 + $0x68] sm:$0xff]  ;;  %v45_v44 = vld [vmem:[%s2178_s0 + $0x60] sm:$0xff]  ;;  %v90_v48 = vld [vmem:[%s2177_s1 + $0x70] sm:$0xff] }
   0xc   :  { %1265 = vmatprep.mubr.msk.bf16.mxu1 %vm1451_vm0, %v1450_v0  ;;  %v46_v45 = vld [vmem:[%s2178_s0 + $0x68] sm:$0xff]  ;;  %v108_v46 = vpack.c.bf16 %v89_v43, %v88_v42  ;;  %v91_v49 = vld [vmem:[%s2177_s1 + $0x78] sm:$0xff]  ;;  %v47_v50 = vld [vmem:[%s2178_s0 + $0x70] sm:$0xff] }
   0xd   :  { %v65_v47 = vpack.c.bf16 %v46_v45, %v45_v44  ;;  %v48_v51 = vld [vmem:[%s2178_s0 + $0x78] sm:$0xff]  ;;  %v109_v52 = vpack.c.bf16 %v91_v49, %v90_v48  ;;  %v92_v54 = vld [vmem:[%s2177_s1 + $0x80] sm:$0xff]  ;;  %v93_v55 = vld [vmem:[%s2177_s1 + $0x88] sm:$0xff] }
   0xe   :  { %v66_v53 = vpack.c.bf16 %v48_v51, %v47_v50  ;;  %v49_v56 = vld [vmem:[%s2178_s0 + $0x80] sm:$0xff]  ;;  %v50_v57 = vld [vmem:[%s2178_s0 + $0x88] sm:$0xff]  ;;  %v110_v58 = vpack.c.bf16 %v93_v55, %v92_v54  ;;  %v94_v60 = vld [vmem:[%s2177_s1 + $0x90] sm:$0xff] }
   0xf   :  { %v67_v59 = vpack.c.bf16 %v50_v57, %v49_v56  ;;  %v95_v61 = vld [vmem:[%s2177_s1 + $0x98] sm:$0xff]  ;;  %v51_v62 = vld [vmem:[%s2178_s0 + $0x90] sm:$0xff]  ;;  %v96_v3 = vld [vmem:[%s2177_s1 + $0xa0] sm:$0xff] }
  0x10   :  { %v52_v63 = vld [vmem:[%s2178_s0 + $0x98] sm:$0xff]  ;;  %v111_v1 = vpack.c.bf16 %v95_v61, %v94_v60  ;;  %v97_v4 = vld [vmem:[%s2177_s1 + $0xa8] sm:$0xff]  ;;  %v53_v5 = vld [vmem:[%s2178_s0 + $0xa0] sm:$0xff] }
  0x11   :  { %v68_v2 = vpack.c.bf16 %v52_v63, %v51_v62  ;;  %v54_v6 = vld [vmem:[%s2178_s0 + $0xa8] sm:$0xff]  ;;  %v112_v7 = vpack.c.bf16 %v97_v4, %v96_v3  ;;  %v98_v9 = vld [vmem:[%s2177_s1 + $0xb0] sm:$0xff]  ;;  %v99_v10 = vld [vmem:[%s2177_s1 + $0xb8] sm:$0xff] }
  0x12   :  { %1210 = vmatmul.mubr.msk.bf16.gmra.mxu0 %vm131_vm1, %v103_v16  ;;  %1266 = vmatmul.mubr.msk.bf16.gmra.mxu1 %vm131_vm1, %v60_v17  ;;  %v69_v8 = vpack.c.bf16 %v54_v6, %v53_v5  ;;  %v55_v11 = vld [vmem:[%s2178_s0 + $0xb0] sm:$0xff]  ;;  %v56_v12 = vld [vmem:[%s2178_s0 + $0xb8] sm:$0xff]  ;;  %v113_v14 = vpack.c.bf16 %v99_v10, %v98_v9  ;;  %v100_v16 = vld [vmem:[%s2177_s1 + $0xc0] sm:$0xff] }
  0x13   :  { %1213 = vmatprep.mubr.msk.bf16.mxu0 %vm1451_vm0, %v1450_v0  ;;  %1269 = vmatprep.mubr.msk.bf16.mxu1 %vm1451_vm0, %v1450_v0  ;;  %v1442_v13 = vld [vmem:[%s2180_s7 + $0x38] sm:$0xff]   ;;  %v70_v15 = vpack.c.bf16 %v56_v12, %v55_v11  ;;  %v101_v17 = vld [vmem:[%s2177_s1 + $0xc8] sm:$0xff]  ;;  %v57_v18 = vld [vmem:[%s2178_s0 + $0xc0] sm:$0xff] }
  0x14   :  { %1368 = vmatpush3.bf16.msra.mxu1 %v1442_v13  ;;  %v58_v19 = vld [vmem:[%s2178_s0 + $0xc8] sm:$0xff]  ;;  %v1443_v20 = vld [vmem:[%s2180_s7 + $0x30] sm:$0xff]   ;;  %v114_v21 = vpack.c.bf16 %v101_v17, %v100_v16  ;;  %v499_v27 = vld [vmem:[%s2181_s2 + $0x18] sm:$0xff] }
  0x15   :  { %1369 = vmatprep.subr.bf16.mxu1 %v1450_v0  ;;  %v497_v24 = vld [vmem:[%s2181_s2 + $0x8] sm:$0xff]  ;;  %v498_v26 = vld [vmem:[%s2181_s2 + $0x10] sm:$0xff]  ;;  %v500_v30 = vld [vmem:[%s2181_s2 + $0x20] sm:$0xff] }
  0x16   :  { %v501_v31 = vld [vmem:[%s2181_s2 + $0x28] sm:$0xff]  ;;  %v1445_v33 = vld [vmem:[%s2180_s7 + $0x20] sm:$0xff]   ;;  %v1446_v39 = vld [vmem:[%s2180_s7 + $0x18] sm:$0xff]  }
  0x17   :  { %v524_v32 = vpack.c.bf16 %v501_v31, %v500_v30  ;;  %v504_v37 = vld [vmem:[%s2181_s2 + $0x40] sm:$0xff]  ;;  %v505_v38 = vld [vmem:[%s2181_s2 + $0x48] sm:$0xff]  ;;  %v507_v42 = vld [vmem:[%s2181_s2 + $0x58] sm:$0xff] }
  0x18   :  { %1370 = vmatpush3.bf16.msra.mxu1 %v1443_v20  ;;  %v1447_v44 = vld [vmem:[%s2180_s7 + $0x10] sm:$0xff]   ;;  %v508_v45 = vld [vmem:[%s2181_s2 + $0x60] sm:$0xff]  ;;  %v511_v49 = vld [vmem:[%s2181_s2 + $0x78] sm:$0xff] }
  0x19   :  { %1371 = vmatprep.subr.bf16.mxu1 %v1450_v0  ;;  %v510_v48 = vld [vmem:[%s2181_s2 + $0x70] sm:$0xff]  ;;  %v1448_v51 = vld [vmem:[%s2180_s7 + $0x8] sm:$0xff]   ;;  %v515_v56 = vld [vmem:[%s2181_s2 + $0x98] sm:$0xff] }
  0x1a   :  { %1214 = vmatmul.mubr.msk.bf16.gmra.mxu0 %vm131_vm1, %v104_v22  ;;  %1270 = vmatmul.mubr.msk.bf16.gmra.mxu1 %vm131_vm1, %v61_v23  ;;  %v71_v22 = vpack.c.bf16 %v58_v19, %v57_v18  ;;  %v496_v23 = vld [vmem:[%s2181_s2] sm:$0xff]  ;;  %v529_v50 = vpack.c.bf16 %v511_v49, %v510_v48  ;;  %v514_v55 = vld [vmem:[%s2181_s2 + $0x90] sm:$0xff]  ;;  %v517_v60 = vld [vmem:[%s2181_s2 + $0xa8] sm:$0xff] }
  0x1b   :  { %1217 = vmatprep.mubr.msk.bf16.mxu0 %vm1451_vm0, %v1450_v0  ;;  %1273 = vmatprep.mubr.msk.bf16.mxu1 %vm1451_vm0, %v1450_v0  ;;  %v522_v25 = vpack.c.bf16 %v497_v24, %v496_v23  ;;  %v531_v57 = vpack.c.bf16 %v515_v56, %v514_v55  ;;  %v518_v62 = vld [vmem:[%s2181_s2 + $0xb0] sm:$0xff]  ;;  %v519_v63 = vld [vmem:[%s2181_s2 + $0xb8] sm:$0xff]  ;;  %v520_v4 = vld [vmem:[%s2181_s2 + $0xc0] sm:$0xff] }
  0x1c   :  { %v521_v5 = vld [vmem:[%s2181_s2 + $0xc8] sm:$0xff] }
  0x1d   :  { %v534_v10 = vpack.c.bf16 %v521_v5, %v520_v4 }
  0x22   :  { %1218 = vmatmul.mubr.msk.bf16.gmra.mxu0 %vm131_vm1, %v105_v28  ;;  %1274 = vmatmul.mubr.msk.bf16.gmra.mxu1 %vm131_vm1, %v62_v29  ;;  %v1444_v28 = vld [vmem:[%s2180_s7 + $0x28] sm:$0xff]   ;;  %v523_v29 = vpack.c.bf16 %v499_v27, %v498_v26 }
  0x23   :  { %1221 = vmatprep.mubr.msk.bf16.mxu0 %vm1451_vm0, %v1450_v0  ;;  %1277 = vmatprep.mubr.msk.bf16.mxu1 %vm1451_vm0, %v1450_v0 }
  0x24   :  { %1372 = vmatpush3.bf16.msra.mxu1 %v1444_v28 }
  0x25   :  { %1373 = vmatprep.subr.bf16.mxu1 %v1450_v0 }
  0x28   :  { %1374 = vmatpush3.bf16.msra.mxu1 %v1445_v33 }
  0x29   :  { %1375 = vmatprep.subr.bf16.mxu1 %v1450_v0 }
  0x2a   :  { %1222 = vmatmul.mubr.msk.bf16.gmra.mxu0 %vm131_vm1, %v106_v34  ;;  %1278 = vmatmul.mubr.msk.bf16.gmra.mxu1 %vm131_vm1, %v63_v35  ;;  %v502_v34 = vld [vmem:[%s2181_s2 + $0x30] sm:$0xff]  ;;  %v503_v35 = vld [vmem:[%s2181_s2 + $0x38] sm:$0xff] }
  0x2b   :  { %1225 = vmatprep.mubr.msk.bf16.mxu0 %vm1451_vm0, %v1450_v0  ;;  %1281 = vmatprep.mubr.msk.bf16.mxu1 %vm1451_vm0, %v1450_v0  ;;  %v525_v36 = vpack.c.bf16 %v503_v35, %v502_v34 }
  0x2c   :  { %1376 = vmatpush3.bf16.msra.mxu1 %v1446_v39 }
  0x2d   :  { %1377 = vmatprep.subr.bf16.mxu1 %v1450_v0 }
  0x30   :  { %1378 = vmatpush3.bf16.msra.mxu1 %v1447_v44 }
  0x31   :  { %1379 = vmatprep.subr.bf16.mxu1 %v1450_v0 }
  0x32   :  { %1226 = vmatmul.mubr.msk.bf16.gmra.mxu0 %vm131_vm1, %v107_v40  ;;  %1282 = vmatmul.mubr.msk.bf16.gmra.mxu1 %vm131_vm1, %v64_v41  ;;  %v526_v40 = vpack.c.bf16 %v505_v38, %v504_v37  ;;  %v506_v41 = vld [vmem:[%s2181_s2 + $0x50] sm:$0xff] }
  0x33   :  { %1229 = vmatprep.mubr.msk.bf16.mxu0 %vm1451_vm0, %v1450_v0  ;;  %1285 = vmatprep.mubr.msk.bf16.mxu1 %vm1451_vm0, %v1450_v0  ;;  %v527_v43 = vpack.c.bf16 %v507_v42, %v506_v41 }
  0x34   :  { %1380 = vmatpush3.bf16.msra.mxu1 %v1448_v51 }
  0x35   :  { %1381 = vmatprep.subr.bf16.mxu1 %v1450_v0 }
  0x3a   :  { %1230 = vmatmul.mubr.msk.bf16.gmra.mxu0 %vm131_vm1, %v108_v46  ;;  %1286 = vmatmul.mubr.msk.bf16.gmra.mxu1 %vm131_vm1, %v65_v47  ;;  %v509_v46 = vld [vmem:[%s2181_s2 + $0x68] sm:$0xff] }
  0x3b   :  { %1233 = vmatprep.mubr.msk.bf16.mxu0 %vm1451_vm0, %v1450_v0  ;;  %1289 = vmatprep.mubr.msk.bf16.mxu1 %vm1451_vm0, %v1450_v0  ;;  %v528_v47 = vpack.c.bf16 %v509_v46, %v508_v45 }
  0x42   :  { %1234 = vmatmul.mubr.msk.bf16.gmra.mxu0 %vm131_vm1, %v109_v52  ;;  %1290 = vmatmul.mubr.msk.bf16.gmra.mxu1 %vm131_vm1, %v66_v53  ;;  %v512_v52 = vld [vmem:[%s2181_s2 + $0x80] sm:$0xff]  ;;  %v513_v53 = vld [vmem:[%s2181_s2 + $0x88] sm:$0xff] }
  0x43   :  { %1237 = vmatprep.mubr.msk.bf16.mxu0 %vm1451_vm0, %v1450_v0  ;;  %1293 = vmatprep.mubr.msk.bf16.mxu1 %vm1451_vm0, %v1450_v0  ;;  %v530_v54 = vpack.c.bf16 %v513_v53, %v512_v52 }
  0x4a   :  { %1238 = vmatmul.mubr.msk.bf16.gmra.mxu0 %vm131_vm1, %v110_v58  ;;  %1294 = vmatmul.mubr.msk.bf16.gmra.mxu1 %vm131_vm1, %v67_v59  ;;  %v1449_v58 = vld [vmem:[%s2180_s7] sm:$0xff]  }
  0x4b   :  { %1241 = vmatprep.mubr.msk.bf16.mxu0 %vm1451_vm0, %v1450_v0  ;;  %1297 = vmatprep.mubr.msk.bf16.mxu1 %vm1451_vm0, %v1450_v0  ;;  %v516_v59 = vld [vmem:[%s2181_s2 + $0xa0] sm:$0xff] }
  0x4c   :  { %1382 = vmatpush3.bf16.msra.mxu1 %v1449_v58  ;;  %v532_v61 = vpack.c.bf16 %v517_v60, %v516_v59 }
  0x52   :  { %1242 = vmatmul.mubr.msk.bf16.gmra.mxu0 %vm131_vm1, %v111_v1  ;;  %1298 = vmatmul.mubr.msk.bf16.gmra.mxu1 %vm131_vm1, %v68_v2  ;;  %v533_v1 = vpack.c.bf16 %v519_v63, %v518_v62 }
  0x53   :  { %1245 = vmatprep.mubr.msk.bf16.mxu0 %vm1451_vm0, %v1450_v0  ;;  %1301 = vmatprep.mubr.msk.bf16.mxu1 %vm1451_vm0, %v1450_v0 }
  0x5a   :  { %1246 = vmatmul.mubr.msk.bf16.gmra.mxu0 %vm131_vm1, %v112_v7  ;;  %1302 = vmatmul.mubr.msk.bf16.gmra.mxu1 %vm131_vm1, %v69_v8 }
  0x5b   :  { %1249 = vmatprep.mubr.msk.bf16.mxu0 %vm1451_vm0, %v1450_v0  ;;  %1305 = vmatprep.mubr.msk.bf16.mxu1 %vm1451_vm0, %v1450_v0 }
  0x62   :  { %1250 = vmatmul.mubr.msk.bf16.gmra.mxu0 %vm131_vm1, %v113_v14  ;;  %1306 = vmatmul.mubr.msk.bf16.gmra.mxu1 %vm131_vm1, %v70_v15 }
  0x63   :  { %1253 = vmatprep.mubr.msk.bf16.mxu0 %vm1451_vm0, %v1450_v0  ;;  %1309 = vmatprep.mubr.msk.bf16.mxu1 %vm1451_vm0, %v1450_v0 }
  0x6a   :  { %1254 = vmatmul.mubr.msk.bf16.gmra.mxu0 %vm131_vm1, %v114_v21  ;;  %1310 = vmatmul.mubr.msk.bf16.gmra.mxu1 %vm131_vm1, %v71_v22 }
  0x6b   :  { %1315 = vmatprep.mubr.msk.bf16.mxu0 %vm1451_vm0, %v1450_v0  ;;  %1383 = vmatprep.mubr.msk.bf16.mxu1 %vm1451_vm0, %v1450_v0 }
  0x72   :  { %1316 = vmatmul.mubr.msk.bf16.vlgmr.msra.gmra.mxu0 %vm543_vm2, %v522_v25 }
  0x73   :  { %1319 = vmatprep.mubr.msk.bf16.mxu0 %vm1451_vm0, %v1450_v0 }
  0x7a   :  { %1320 = vmatmul.mubr.msk.bf16.gmra.mxu0 %vm543_vm2, %v523_v29 }
  0x7b   :  { %1323 = vmatprep.mubr.msk.bf16.mxu0 %vm1451_vm0, %v1450_v0 }
  0x82   :  { %1324 = vmatmul.mubr.msk.bf16.gmra.mxu0 %vm543_vm2, %v524_v32 }
  0x83   :  { %1327 = vmatprep.mubr.msk.bf16.mxu0 %vm1451_vm0, %v1450_v0 }
  0x8a   :  { %1328 = vmatmul.mubr.msk.bf16.gmra.mxu0 %vm543_vm2, %v525_v36 }
  0x8b   :  { %1331 = vmatprep.mubr.msk.bf16.mxu0 %vm1451_vm0, %v1450_v0 }
  0x92   :  { %1332 = vmatmul.mubr.msk.bf16.gmra.mxu0 %vm543_vm2, %v526_v40 }
  0x93   :  { %1335 = vmatprep.mubr.msk.bf16.mxu0 %vm1451_vm0, %v1450_v0 }
  0x9a   :  { %1336 = vmatmul.mubr.msk.bf16.gmra.mxu0 %vm543_vm2, %v527_v43 }
  0x9b   :  { %1339 = vmatprep.mubr.msk.bf16.mxu0 %vm1451_vm0, %v1450_v0 }
  0xa2   :  { %1340 = vmatmul.mubr.msk.bf16.gmra.mxu0 %vm543_vm2, %v528_v47 }
  0xa3   :  { %1343 = vmatprep.mubr.msk.bf16.mxu0 %vm1451_vm0, %v1450_v0 }
  0xaa   :  { %1344 = vmatmul.mubr.msk.bf16.gmra.mxu0 %vm543_vm2, %v529_v50 }
  0xab   :  { %1347 = vmatprep.mubr.msk.bf16.mxu0 %vm1451_vm0, %v1450_v0 }
  0xb2   :  { %1348 = vmatmul.mubr.msk.bf16.gmra.mxu0 %vm543_vm2, %v530_v54 }
  0xb3   :  { %1351 = vmatprep.mubr.msk.bf16.mxu0 %vm1451_vm0, %v1450_v0 }
  0xba   :  { %1352 = vmatmul.mubr.msk.bf16.gmra.mxu0 %vm543_vm2, %v531_v57 }
  0xbb   :  { %1355 = vmatprep.mubr.msk.bf16.mxu0 %vm1451_vm0, %v1450_v0 }
  0xc2   :  { %1356 = vmatmul.mubr.msk.bf16.gmra.mxu0 %vm543_vm2, %v532_v61 }
  0xc3   :  { %1359 = vmatprep.mubr.msk.bf16.mxu0 %vm1451_vm0, %v1450_v0 }
  0xca   :  { %v205_v2 = vpop.f32.mrf.mxu0  ;;  %1360 = vmatmul.mubr.msk.bf16.gmra.mxu0 %vm543_vm2, %v533_v1  ;;  %v393_v3 = vpop.f32.mrf.mxu1 }
  0xcb   :  { %1363 = vmatprep.mubr.msk.bf16.mxu0 %vm1451_vm0, %v1450_v0  ;;  %v1906_v6 = vadd.f32 %v393_v3, %v205_v2 }
  0xcc   :  { %v1207_v7 = vpop.f32.mrf.mxu0  ;;  %v1263_v8 = vpop.f32.mrf.mxu1 }
  0xce   :  { %v208_v9 = vpop.f32.mrf.mxu0  ;;  %v396_v11 = vpop.f32.mrf.mxu1 }
  0xcf   :  { %v1908_v12 = vadd.f32 %v396_v11, %v208_v9 }
  0xd0   :  { %v1208_v13 = vpop.f32.mrf.mxu0  ;;  %v1264_v14 = vpop.f32.mrf.mxu1 }
  0xd2   :  { %v213_v15 = vpop.f32.mrf.mxu0  ;;  %1364 = vmatmul.mubr.msk.bf16.gmra.mxu0 %vm543_vm2, %v534_v10  ;;  %v401_v16 = vpop.f32.mrf.mxu1 }
  0xd3   :  { %v1911_v17 = vadd.f32 %v401_v16, %v213_v15 }
  0xd4   :  { %v1211_v18 = vpop.f32.mrf.mxu0  ;;  %v1267_v19 = vpop.f32.mrf.mxu1 }
  0xd6   :  { %v216_v20 = vpop.f32.mrf.mxu0  ;;  %v404_v21 = vpop.f32.mrf.mxu1 }
  0xd7   :  { %v1913_v22 = vadd.f32 %v404_v21, %v216_v20 }
  0xd8   :  { %v1212_v23 = vpop.f32.mrf.mxu0  ;;  %v1268_v24 = vpop.f32.mrf.mxu1 }
  0xda   :  { %v221_v25 = vpop.f32.mrf.mxu0  ;;  %v409_v26 = vpop.f32.mrf.mxu1 }
  0xdb   :  { %v1915_v27 = vadd.f32 %v409_v26, %v221_v25 }
  0xdc   :  { %v1215_v28 = vpop.f32.mrf.mxu0  ;;  %v1271_v29 = vpop.f32.mrf.mxu1 }
  0xde   :  { %v224_v30 = vpop.f32.mrf.mxu0  ;;  %v412_v31 = vpop.f32.mrf.mxu1 }
  0xdf   :  { %v1917_v32 = vadd.f32 %v412_v31, %v224_v30 }
  0xe0   :  { %v1216_v33 = vpop.f32.mrf.mxu0  ;;  %v1272_v34 = vpop.f32.mrf.mxu1 }
  0xe2   :  { %v229_v35 = vpop.f32.mrf.mxu0  ;;  %v417_v36 = vpop.f32.mrf.mxu1 }
  0xe3   :  { %v1919_v37 = vadd.f32 %v417_v36, %v229_v35 }
  0xe4   :  { %v1219_v38 = vpop.f32.mrf.mxu0  ;;  %v1275_v39 = vpop.f32.mrf.mxu1 }
  0xe6   :  { %v232_v40 = vpop.f32.mrf.mxu0  ;;  %v420_v41 = vpop.f32.mrf.mxu1 }
  0xe7   :  { %v1921_v42 = vadd.f32 %v420_v41, %v232_v40 }
  0xe8   :  { %v1220_v43 = vpop.f32.mrf.mxu0  ;;  %v1276_v44 = vpop.f32.mrf.mxu1 }
  0xea   :  { %v237_v45 = vpop.f32.mrf.mxu0  ;;  %v425_v46 = vpop.f32.mrf.mxu1 }
  0xeb   :  { %v1923_v47 = vadd.f32 %v425_v46, %v237_v45 }
  0xec   :  { %v1223_v48 = vpop.f32.mrf.mxu0  ;;  %v1279_v49 = vpop.f32.mrf.mxu1 }
  0xee   :  { %v240_v50 = vpop.f32.mrf.mxu0  ;;  %v428_v51 = vpop.f32.mrf.mxu1 }
  0xef   :  { %v1925_v52 = vadd.f32 %v428_v51, %v240_v50 }
  0xf0   :  { %v1224_v53 = vpop.f32.mrf.mxu0  ;;  %v1280_v54 = vpop.f32.mrf.mxu1 }
  0xf2   :  { %v245_v55 = vpop.f32.mrf.mxu0  ;;  %v433_v56 = vpop.f32.mrf.mxu1 }
  0xf3   :  { %v1927_v57 = vadd.f32 %v433_v56, %v245_v55 }
  0xf4   :  { %v1227_v58 = vpop.f32.mrf.mxu0  ;;  %v1283_v59 = vpop.f32.mrf.mxu1 }
  0xf6   :  { %v248_v60 = vpop.f32.mrf.mxu0  ;;  %v436_v61 = vpop.f32.mrf.mxu1 }
  0xf7   :  { %v1929_v62 = vadd.f32 %v436_v61, %v248_v60 }
  0xf8   :  { %v1228_v63 = vpop.f32.mrf.mxu0  ;;  %v1284_v1 = vpop.f32.mrf.mxu1 }
  0xfa   :  { %v253_v2 = vpop.f32.mrf.mxu0  ;;  %v441_v3 = vpop.f32.mrf.mxu1 }
  0xfb   :  { %v1931_v4 = vadd.f32 %v441_v3, %v253_v2 }
  0xfc   :  { %v1231_v5 = vpop.f32.mrf.mxu0  ;;  %v1287_v7 = vpop.f32.mrf.mxu1 }
  0xfe   :  { %v256_v8 = vpop.f32.mrf.mxu0  ;;  %v444_v9 = vpop.f32.mrf.mxu1 }
  0xff   :  { %v1933_v10 = vadd.f32 %v444_v9, %v256_v8 }
 0x100   :  { %v1232_v11 = vpop.f32.mrf.mxu0  ;;  %v1288_v13 = vpop.f32.mrf.mxu1 }
 0x102   :  { %v261_v14 = vpop.f32.mrf.mxu0  ;;  %v449_v15 = vpop.f32.mrf.mxu1 }
 0x103   :  { %v1935_v16 = vadd.f32 %v449_v15, %v261_v14 }
 0x104   :  { %v1235_v18 = vpop.f32.mrf.mxu0  ;;  %v1291_v19 = vpop.f32.mrf.mxu1 }
 0x106   :  { %v264_v20 = vpop.f32.mrf.mxu0  ;;  %v452_v21 = vpop.f32.mrf.mxu1 }
 0x107   :  { %v1937_v23 = vadd.f32 %v452_v21, %v264_v20 }
 0x108   :  { %v1236_v24 = vpop.f32.mrf.mxu0  ;;  %v1292_v25 = vpop.f32.mrf.mxu1 }
 0x10a   :  { %v269_v26 = vpop.f32.mrf.mxu0  ;;  %v457_v28 = vpop.f32.mrf.mxu1 }
 0x10b   :  { %v1939_v29 = vadd.f32 %v457_v28, %v269_v26 }
 0x10c   :  { %v1239_v30 = vpop.f32.mrf.mxu0  ;;  %v1295_v31 = vpop.f32.mrf.mxu1 }
 0x10e   :  { %v272_v33 = vpop.f32.mrf.mxu0  ;;  %v460_v34 = vpop.f32.mrf.mxu1 }
 0x10f   :  { %v1941_v35 = vadd.f32 %v460_v34, %v272_v33  ;;  %v1963_v34 = vld [vmem:[%s2182_s6] ss:$0 sm:$0xff] }
 0x110   :  { %v1240_v36 = vpop.f32.mrf.mxu0  ;;  %v1296_v38 = vpop.f32.mrf.mxu1 }
 0x112   :  { %v277_v39 = vpop.f32.mrf.mxu0  ;;  %v465_v40 = vpop.f32.mrf.mxu1 }
 0x113   :  { %v1943_v41 = vadd.f32 %v465_v40, %v277_v39 }
 0x114   :  { %v1243_v43 = vpop.f32.mrf.mxu0  ;;  %v1299_v44 = vpop.f32.mrf.mxu1 }
 0x116   :  { %v280_v45 = vpop.f32.mrf.mxu0  ;;  %v468_v46 = vpop.f32.mrf.mxu1 }
 0x117   :  { %v1945_v48 = vadd.f32 %v468_v46, %v280_v45 }
 0x118   :  { %v1244_v49 = vpop.f32.mrf.mxu0  ;;  %v1300_v50 = vpop.f32.mrf.mxu1 }
 0x11a   :  { %v285_v51 = vpop.f32.mrf.mxu0  ;;  %v473_v53 = vpop.f32.mrf.mxu1 }
 0x11b   :  { %v1947_v54 = vadd.f32 %v473_v53, %v285_v51 }
 0x11c   :  { %v1247_v55 = vpop.f32.mrf.mxu0  ;;  %v1303_v56 = vpop.f32.mrf.mxu1 }
 0x11e   :  { %v288_v58 = vpop.f32.mrf.mxu0  ;;  %v476_v59 = vpop.f32.mrf.mxu1 }
 0x11f   :  { %v1949_v60 = vadd.f32 %v476_v59, %v288_v58 }
 0x120   :  { %v1248_v61 = vpop.f32.mrf.mxu0  ;;  %v1304_v63 = vpop.f32.mrf.mxu1 }
 0x122   :  { %v293_v1 = vpop.f32.mrf.mxu0  ;;  %v481_v2 = vpop.f32.mrf.mxu1 }
 0x123   :  { %v1951_v3 = vadd.f32 %v481_v2, %v293_v1 }
 0x124   :  { %v1251_v5 = vpop.f32.mrf.mxu0  ;;  %v1307_v7 = vpop.f32.mrf.mxu1 }
 0x126   :  { %v296_v8 = vpop.f32.mrf.mxu0  ;;  %v484_v9 = vpop.f32.mrf.mxu1 }
 0x127   :  { %v1953_v11 = vadd.f32 %v484_v9, %v296_v8 }
 0x128   :  { %v1252_v13 = vpop.f32.mrf.mxu0  ;;  %v1308_v14 = vpop.f32.mrf.mxu1 }
 0x12a   :  { %v301_v15 = vpop.f32.mrf.mxu0  ;;  %v489_v18 = vpop.f32.mrf.mxu1 }
 0x12b   :  { %v1955_v19 = vadd.f32 %v489_v18, %v301_v15 }
 0x12c   :  { %v1255_v20 = vpop.f32.mrf.mxu0  ;;  %v1311_v21 = vpop.f32.mrf.mxu1 }
 0x12e   :  { %v304_v24 = vpop.f32.mrf.mxu0  ;;  %v492_v25 = vpop.f32.mrf.mxu1 }
 0x12f   :  { %v1957_v26 = vadd.f32 %v492_v25, %v304_v24 }
 0x130   :  { %v1256_v28 = vpop.f32.mrf.mxu0  ;;  %v1312_v30 = vpop.f32.mrf.mxu1 }
 0x132   :  { %v617_v31 = vpop.f32.mrf.mxu0 }
 0x133   :  { %v720_v33 = vadd.f32 %v617_v31, %v1906_v6 }
 0x134   :  { %v1317_v36 = vpop.f32.mrf.mxu0 }
 0x135   :  { %v753_v39 = vadd.f32 %v1963_v34, %v720_v33 }
 0x136   :  { %v620_v38 = vpop.f32.mrf.mxu0 }
 0x137   :  { %v721_v40 = vadd.f32 %v620_v38, %v1908_v12  ;;  %v779_v46 = vmax.f32 %v753_v39, 0.0 }
 0x138   :  { %v1318_v43 = vpop.f32.mrf.mxu0 }
 0x139   :  { %v754_v44 = vadd.f32 %v1963_v34, %v721_v40 }
 0x13a   :  { %v625_v45 = vpop.f32.mrf.mxu0 }
 0x13b   :  { %v780_v49 = vmax.f32 %v754_v44, 0.0  ;;  %v722_v50 = vadd.f32 %v625_v45, %v1911_v17 }
 0x13c   :  { %v1321_v6 = vpop.f32.mrf.mxu0 }
 0x13d   :  { %v805_v51 = vpack.c.bf16 %v780_v49, %v779_v46  ;;  %v755_v55 = vadd.f32 %v1963_v34, %v722_v50 }
 0x13e   :  { %v628_v53 = vpop.f32.mrf.mxu0 }
 0x13f   :  { %v723_v56 = vadd.f32 %v628_v53, %v1913_v22  ;;  %1384 = vmatmul.mubr.bf16.vlgmr.msra.gmra.mxu1 %v805_v51  ;;  %v781_v61 = vmax.f32 %v755_v55, 0.0 }
 0x140   :  { %v1322_v58 = vpop.f32.mrf.mxu0  ;;  %1387 = vmatprep.mubr.msk.bf16.mxu1 %vm1451_vm0, %v1450_v0 }
 0x141   :  { %v756_v12 = vadd.f32 %v1963_v34, %v723_v56 }
 0x142   :  { %v633_v59 = vpop.f32.mrf.mxu0 }
 0x143   :  { %v782_v63 = vmax.f32 %v756_v12, 0.0  ;;  %v724_v1 = vadd.f32 %v633_v59, %v1915_v27 }
 0x144   :  { %v1325_v17 = vpop.f32.mrf.mxu0 }
 0x145   :  { %v806_v2 = vpack.c.bf16 %v782_v63, %v781_v61  ;;  %v757_v7 = vadd.f32 %v1963_v34, %v724_v1 }
 0x146   :  { %v636_v5 = vpop.f32.mrf.mxu0 }
 0x147   :  { %v725_v8 = vadd.f32 %v636_v5, %v1917_v32  ;;  %1388 = vmatmul.mubr.bf16.gmra.mxu1 %v806_v2  ;;  %v783_v14 = vmax.f32 %v757_v7, 0.0 }
 0x148   :  { %v1326_v22 = vpop.f32.mrf.mxu0  ;;  %1391 = vmatprep.mubr.msk.bf16.mxu1 %vm1451_vm0, %v1450_v0 }
 0x149   :  { %v758_v9 = vadd.f32 %v1963_v34, %v725_v8 }
 0x14a   :  { %v641_v13 = vpop.f32.mrf.mxu0 }
 0x14b   :  { %v784_v15 = vmax.f32 %v758_v9, 0.0  ;;  %v726_v18 = vadd.f32 %v641_v13, %v1919_v37 }
 0x14c   :  { %v1329_v27 = vpop.f32.mrf.mxu0 }
 0x14d   :  { %v807_v20 = vpack.c.bf16 %v784_v15, %v783_v14  ;;  %v759_v24 = vadd.f32 %v1963_v34, %v726_v18 }
 0x14e   :  { %v644_v21 = vpop.f32.mrf.mxu0 }
 0x14f   :  { %v727_v25 = vadd.f32 %v644_v21, %v1921_v42  ;;  %1392 = vmatmul.mubr.bf16.gmra.mxu1 %v807_v20  ;;  %v785_v31 = vmax.f32 %v759_v24, 0.0 }
 0x150   :  { %v1330_v32 = vpop.f32.mrf.mxu0  ;;  %1395 = vmatprep.mubr.msk.bf16.mxu1 %vm1451_vm0, %v1450_v0 }
 0x151   :  { %v760_v28 = vadd.f32 %v1963_v34, %v727_v25 }
 0x152   :  { %v649_v30 = vpop.f32.mrf.mxu0 }
 0x153   :  { %v786_v33 = vmax.f32 %v760_v28, 0.0  ;;  %v728_v36 = vadd.f32 %v649_v30, %v1923_v47 }
 0x154   :  { %v1333_v37 = vpop.f32.mrf.mxu0 }
 0x155   :  { %v808_v38 = vpack.c.bf16 %v786_v33, %v785_v31  ;;  %v761_v40 = vadd.f32 %v1963_v34, %v728_v36 }
 0x156   :  { %v652_v39 = vpop.f32.mrf.mxu0 }
 0x157   :  { %v729_v43 = vadd.f32 %v652_v39, %v1925_v52  ;;  %1396 = vmatmul.mubr.bf16.gmra.mxu1 %v808_v38  ;;  %v787_v46 = vmax.f32 %v761_v40, 0.0 }
 0x158   :  { %v1334_v42 = vpop.f32.mrf.mxu0  ;;  %1399 = vmatprep.mubr.msk.bf16.mxu1 %vm1451_vm0, %v1450_v0 }
 0x159   :  { %v762_v44 = vadd.f32 %v1963_v34, %v729_v43 }
 0x15a   :  { %v657_v45 = vpop.f32.mrf.mxu0 }
 0x15b   :  { %v788_v49 = vmax.f32 %v762_v44, 0.0  ;;  %v730_v50 = vadd.f32 %v657_v45, %v1927_v57 }
 0x15c   :  { %v1337_v47 = vpop.f32.mrf.mxu0 }
 0x15d   :  { %v809_v6 = vpack.c.bf16 %v788_v49, %v787_v46  ;;  %v763_v53 = vadd.f32 %v1963_v34, %v730_v50 }
 0x15e   :  { %v660_v51 = vpop.f32.mrf.mxu0 }
 0x15f   :  { %v731_v55 = vadd.f32 %v660_v51, %v1929_v62  ;;  %1400 = vmatmul.mubr.bf16.gmra.mxu1 %v809_v6  ;;  %v789_v12 = vmax.f32 %v763_v53, 0.0 }
 0x160   :  { %v1338_v52 = vpop.f32.mrf.mxu0  ;;  %1403 = vmatprep.mubr.msk.bf16.mxu1 %vm1451_vm0, %v1450_v0 }
 0x161   :  { %v764_v56 = vadd.f32 %v1963_v34, %v731_v55 }
 0x162   :  { %v665_v58 = vpop.f32.mrf.mxu0 }
 0x163   :  { %v790_v59 = vmax.f32 %v764_v56, 0.0  ;;  %v732_v61 = vadd.f32 %v665_v58, %v1931_v4 }
 0x164   :  { %v1341_v57 = vpop.f32.mrf.mxu0 }
 0x165   :  { %v810_v63 = vpack.c.bf16 %v790_v59, %v789_v12  ;;  %v765_v17 = vadd.f32 %v1963_v34, %v732_v61 }
 0x166   :  { %v668_v1 = vpop.f32.mrf.mxu0 }
 0x167   :  { %v733_v2 = vadd.f32 %v668_v1, %v1933_v10  ;;  %1404 = vmatmul.mubr.bf16.gmra.mxu1 %v810_v63  ;;  %v791_v8 = vmax.f32 %v765_v17, 0.0 }
 0x168   :  { %v1342_v62 = vpop.f32.mrf.mxu0  ;;  %1407 = vmatprep.mubr.msk.bf16.mxu1 %vm1451_vm0, %v1450_v0 }
 0x169   :  { %v766_v5 = vadd.f32 %v1963_v34, %v733_v2 }
 0x16a   :  { %v673_v7 = vpop.f32.mrf.mxu0 }
 0x16b   :  { %v792_v22 = vmax.f32 %v766_v5, 0.0  ;;  %v734_v9 = vadd.f32 %v673_v7, %v1935_v16 }
 0x16c   :  { %v1345_v4 = vpop.f32.mrf.mxu0 }
 0x16d   :  { %v811_v13 = vpack.c.bf16 %v792_v22, %v791_v8  ;;  %v767_v15 = vadd.f32 %v1963_v34, %v734_v9 }
 0x16e   :  { %v676_v14 = vpop.f32.mrf.mxu0 }
 0x16f   :  { %v735_v18 = vadd.f32 %v676_v14, %v1937_v23  ;;  %1408 = vmatmul.mubr.bf16.gmra.mxu1 %v811_v13  ;;  %v793_v21 = vmax.f32 %v767_v15, 0.0 }
 0x170   :  { %v1346_v10 = vpop.f32.mrf.mxu0  ;;  %1411 = vmatprep.mubr.msk.bf16.mxu1 %vm1451_vm0, %v1450_v0 }
 0x171   :  { %v768_v27 = vadd.f32 %v1963_v34, %v735_v18 }
 0x172   :  { %v681_v20 = vpop.f32.mrf.mxu0 }
 0x173   :  { %v794_v24 = vmax.f32 %v768_v27, 0.0  ;;  %v736_v25 = vadd.f32 %v681_v20, %v1939_v29 }
 0x174   :  { %v1349_v16 = vpop.f32.mrf.mxu0 }
 0x175   :  { %v812_v32 = vpack.c.bf16 %v794_v24, %v793_v21  ;;  %v769_v30 = vadd.f32 %v1963_v34, %v736_v25 }
 0x176   :  { %v684_v28 = vpop.f32.mrf.mxu0 }
 0x177   :  { %v737_v31 = vadd.f32 %v684_v28, %v1941_v35  ;;  %1412 = vmatmul.mubr.bf16.gmra.mxu1 %v812_v32  ;;  %v795_v37 = vmax.f32 %v769_v30, 0.0 }
 0x178   :  { %v1350_v23 = vpop.f32.mrf.mxu0  ;;  %1415 = vmatprep.mubr.msk.bf16.mxu1 %vm1451_vm0, %v1450_v0 }
 0x179   :  { %v770_v33 = vadd.f32 %v1963_v34, %v737_v31 }
 0x17a   :  { %v689_v36 = vpop.f32.mrf.mxu0 }
 0x17b   :  { %v796_v38 = vmax.f32 %v770_v33, 0.0  ;;  %v738_v39 = vadd.f32 %v689_v36, %v1943_v41 }
 0x17c   :  { %v1353_v29 = vpop.f32.mrf.mxu0 }
 0x17d   :  { %v813_v40 = vpack.c.bf16 %v796_v38, %v795_v37  ;;  %v771_v42 = vadd.f32 %v1963_v34, %v738_v39 }
 0x17e   :  { %v692_v43 = vpop.f32.mrf.mxu0 }
 0x17f   :  { %v739_v44 = vadd.f32 %v692_v43, %v1945_v48  ;;  %1416 = vmatmul.mubr.bf16.gmra.mxu1 %v813_v40  ;;  %v797_v49 = vmax.f32 %v771_v42, 0.0 }
 0x180   :  { %v1354_v35 = vpop.f32.mrf.mxu0  ;;  %1419 = vmatprep.mubr.msk.bf16.mxu1 %vm1451_vm0, %v1450_v0 }
 0x181   :  { %v772_v45 = vadd.f32 %v1963_v34, %v739_v44 }
 0x182   :  { %v697_v46 = vpop.f32.mrf.mxu0 }
 0x183   :  { %v798_v50 = vmax.f32 %v772_v45, 0.0  ;;  %v740_v47 = vadd.f32 %v697_v46, %v1947_v54 }
 0x184   :  { %v1357_v41 = vpop.f32.mrf.mxu0 }
 0x185   :  { %v814_v6 = vpack.c.bf16 %v798_v50, %v797_v49  ;;  %v773_v53 = vadd.f32 %v1963_v34, %v740_v47 }
 0x186   :  { %v700_v51 = vpop.f32.mrf.mxu0 }
 0x187   :  { %v741_v55 = vadd.f32 %v700_v51, %v1949_v60  ;;  %1420 = vmatmul.mubr.bf16.gmra.mxu1 %v814_v6  ;;  %v799_v58 = vmax.f32 %v773_v53, 0.0 }
 0x188   :  { %v1358_v48 = vpop.f32.mrf.mxu0  ;;  %1423 = vmatprep.mubr.msk.bf16.mxu1 %vm1451_vm0, %v1450_v0 }
 0x189   :  { %v774_v52 = vadd.f32 %v1963_v34, %v741_v55 }
 0x18a   :  { %v705_v56 = vpop.f32.mrf.mxu0 }
 0x18b   :  { %v800_v12 = vmax.f32 %v774_v52, 0.0  ;;  %v742_v59 = vadd.f32 %v705_v56, %v1951_v3 }
 0x18c   :  { %v1361_v54 = vpop.f32.mrf.mxu0 }
 0x18d   :  { %v815_v61 = vpack.c.bf16 %v800_v12, %v799_v58  ;;  %v775_v63 = vadd.f32 %v1963_v34, %v742_v59 }
 0x18e   :  { %v708_v57 = vpop.f32.mrf.mxu0 }
 0x18f   :  { %v743_v1 = vadd.f32 %v708_v57, %v1953_v11  ;;  %1424 = vmatmul.mubr.bf16.gmra.mxu1 %v815_v61  ;;  %v801_v62 = vmax.f32 %v775_v63, 0.0 }
 0x190   :  { %v1362_v60 = vpop.f32.mrf.mxu0  ;;  %1427 = vmatprep.mubr.msk.bf16.mxu1 %vm1451_vm0, %v1450_v0 }
 0x191   :  { %v776_v17 = vadd.f32 %v1963_v34, %v743_v1 }
 0x192   :  { %v713_v2 = vpop.f32.mrf.mxu0 }
 0x193   :  { %v802_v5 = vmax.f32 %v776_v17, 0.0  ;;  %v744_v7 = vadd.f32 %v713_v2, %v1955_v19  ;;  %v2043_v19 = vld [vmem:[%s2183_s8] ss:$0 sm:$0xff] }
 0x194   :  { %v1365_v3 = vpop.f32.mrf.mxu0 }
 0x195   :  { %v816_v8 = vpack.c.bf16 %v802_v5, %v801_v62  ;;  %v777_v9 = vadd.f32 %v1963_v34, %v744_v7 }
 0x196   :  { %v716_v22 = vpop.f32.mrf.mxu0 }
 0x197   :  { %v745_v4 = vadd.f32 %v716_v22, %v1957_v26  ;;  %1428 = vmatmul.mubr.bf16.gmra.mxu1 %v816_v8  ;;  %v803_v14 = vmax.f32 %v777_v9, 0.0 }
 0x198   :  { %v1366_v11 = vpop.f32.mrf.mxu0  ;;  %1431 = vmatprep.mubr.msk.bf16.mxu1 %vm1451_vm0, %v1450_v0 }
 0x199   :  { %v778_v13 = vadd.f32 %v1963_v34, %v745_v4 }
 0x19b   :  { %v804_v15 = vmax.f32 %v778_v13, 0.0 }
 0x19d   :  { %v817_v18 = vpack.c.bf16 %v804_v15, %v803_v14 }
 0x19f   :  { %1432 = vmatmul.mubr.bf16.gmra.mxu1 %v817_v18 }
 0x1ff   :  { %v923_v10 = vpop.f32.mrf.mxu1 }
 0x200   :  { %v924_v27 = vadd.f32 %v2043_v19, %v923_v10 }
 0x201   :  { %v1385_v26 = vpop.f32.mrf.mxu1 }
 0x202   :  { %v1026_v20 = vmax.f32 %v924_v27, 0.0 }
 0x203   :  { %v926_v21 = vpop.f32.mrf.mxu1 }
 0x204   :  { %1052 = vst.msk [vmem:[%s2184_s9] sm:$0xff] %vm543_vm2, %v1026_v20  ;;  %v927_v0 = vadd.f32 %v2043_v19, %v926_v21 }
 0x205   :  { %v1386_v34 = vpop.f32.mrf.mxu1 }
 0x206   :  { %v1027_v24 = vmax.f32 %v927_v0, 0.0 }
 0x207   :  { %v931_v25 = vpop.f32.mrf.mxu1 }
 0x208   :  { %1053 = vst.msk [vmem:[%s2184_s9 + $0x8] sm:$0xff] %vm543_vm2, %v1027_v24  ;;  %v932_v16 = vadd.f32 %v2043_v19, %v931_v25 }
 0x209   :  { %v1389_v32 = vpop.f32.mrf.mxu1 }
 0x20a   :  { %v1028_v28 = vmax.f32 %v932_v16, 0.0 }
 0x20b   :  { %v934_v30 = vpop.f32.mrf.mxu1 }
 0x20c   :  { %1054 = vst.msk [vmem:[%s2184_s9 + $0x10] sm:$0xff] %vm543_vm2, %v1028_v28  ;;  %v935_v31 = vadd.f32 %v2043_v19, %v934_v30 }
 0x20d   :  { %v1390_v23 = vpop.f32.mrf.mxu1 }
 0x20e   :  { %v1029_v33 = vmax.f32 %v935_v31, 0.0 }
 0x20f   :  { %v939_v36 = vpop.f32.mrf.mxu1 }
 0x210   :  { %1055 = vst.msk [vmem:[%s2184_s9 + $0x18] sm:$0xff] %vm543_vm2, %v1029_v33  ;;  %v940_v37 = vadd.f32 %v2043_v19, %v939_v36 }
 0x211   :  { %v1393_v38 = vpop.f32.mrf.mxu1 }
 0x212   :  { %v1030_v39 = vmax.f32 %v940_v37, 0.0 }
 0x213   :  { %v942_v29 = vpop.f32.mrf.mxu1 }
 0x214   :  { %1056 = vst.msk [vmem:[%s2184_s9 + $0x20] sm:$0xff] %vm543_vm2, %v1030_v39  ;;  %v943_v40 = vadd.f32 %v2043_v19, %v942_v29 }
 0x215   :  { %v1394_v43 = vpop.f32.mrf.mxu1 }
 0x216   :  { %v1031_v42 = vmax.f32 %v943_v40, 0.0 }
 0x217   :  { %v947_v44 = vpop.f32.mrf.mxu1 }
 0x218   :  { %1057 = vst.msk [vmem:[%s2184_s9 + $0x28] sm:$0xff] %vm543_vm2, %v1031_v42  ;;  %v948_v35 = vadd.f32 %v2043_v19, %v947_v44 }
 0x219   :  { %v1397_v45 = vpop.f32.mrf.mxu1 }
 0x21a   :  { %v1032_v46 = vmax.f32 %v948_v35, 0.0 }
 0x21b   :  { %v950_v49 = vpop.f32.mrf.mxu1 }
 0x21c   :  { %1058 = vst.msk [vmem:[%s2184_s9 + $0x30] sm:$0xff] %vm543_vm2, %v1032_v46  ;;  %v951_v50 = vadd.f32 %v2043_v19, %v950_v49 }
 0x21d   :  { %v1398_v47 = vpop.f32.mrf.mxu1 }
 0x21e   :  { %v1033_v41 = vmax.f32 %v951_v50, 0.0 }
 0x21f   :  { %v955_v6 = vpop.f32.mrf.mxu1 }
 0x220   :  { %1059 = vst.msk [vmem:[%s2184_s9 + $0x38] sm:$0xff] %vm543_vm2, %v1033_v41  ;;  %v956_v51 = vadd.f32 %v2043_v19, %v955_v6 }
 0x221   :  { %v1401_v53 = vpop.f32.mrf.mxu1 }
 0x222   :  { %v1034_v55 = vmax.f32 %v956_v51, 0.0 }
 0x223   :  { %v958_v48 = vpop.f32.mrf.mxu1 }
 0x224   :  { %1060 = vst.msk [vmem:[%s2184_s9 + $0x40] sm:$0xff] %vm543_vm2, %v1034_v55  ;;  %v959_v52 = vadd.f32 %v2043_v19, %v958_v48 }
 0x225   :  { %v1402_v56 = vpop.f32.mrf.mxu1 }
 0x226   :  { %v1035_v58 = vmax.f32 %v959_v52, 0.0 }
 0x227   :  { %v963_v12 = vpop.f32.mrf.mxu1 }
 0x228   :  { %1061 = vst.msk [vmem:[%s2184_s9 + $0x48] sm:$0xff] %vm543_vm2, %v1035_v58  ;;  %v964_v59 = vadd.f32 %v2043_v19, %v963_v12 }
 0x229   :  { %v1405_v54 = vpop.f32.mrf.mxu1 }
 0x22a   :  { %v1036_v61 = vmax.f32 %v964_v59, 0.0 }
 0x22b   :  { %v966_v57 = vpop.f32.mrf.mxu1 }
 0x22c   :  { %1062 = vst.msk [vmem:[%s2184_s9 + $0x50] sm:$0xff] %vm543_vm2, %v1036_v61  ;;  %v967_v63 = vadd.f32 %v2043_v19, %v966_v57 }
 0x22d   :  { %v1406_v1 = vpop.f32.mrf.mxu1 }
 0x22e   :  { %v1037_v60 = vmax.f32 %v967_v63, 0.0 }
 0x22f   :  { %v971_v17 = vpop.f32.mrf.mxu1 }
 0x230   :  { %1063 = vst.msk [vmem:[%s2184_s9 + $0x58] sm:$0xff] %vm543_vm2, %v1037_v60  ;;  %v972_v2 = vadd.f32 %v2043_v19, %v971_v17 }
 0x231   :  { %v1409_v62 = vpop.f32.mrf.mxu1 }
 0x232   :  { %v1038_v5 = vmax.f32 %v972_v2, 0.0 }
 0x233   :  { %v974_v7 = vpop.f32.mrf.mxu1 }
 0x234   :  { %1064 = vst.msk [vmem:[%s2184_s9 + $0x60] sm:$0xff] %vm543_vm2, %v1038_v5  ;;  %v975_v3 = vadd.f32 %v2043_v19, %v974_v7 }
 0x235   :  { %v1410_v8 = vpop.f32.mrf.mxu1 }
 0x236   :  { %v1039_v22 = vmax.f32 %v975_v3, 0.0 }
 0x237   :  { %v979_v9 = vpop.f32.mrf.mxu1 }
 0x238   :  { %1065 = vst.msk [vmem:[%s2184_s9 + $0x68] sm:$0xff] %vm543_vm2, %v1039_v22  ;;  %v980_v4 = vadd.f32 %v2043_v19, %v979_v9 }
 0x239   :  { %v1413_v11 = vpop.f32.mrf.mxu1 }
 0x23a   :  { %v1040_v13 = vmax.f32 %v980_v4, 0.0 }
 0x23b   :  { %v982_v14 = vpop.f32.mrf.mxu1 }
 0x23c   :  { %1066 = vst.msk [vmem:[%s2184_s9 + $0x70] sm:$0xff] %vm543_vm2, %v1040_v13  ;;  %v983_v15 = vadd.f32 %v2043_v19, %v982_v14 }
 0x23d   :  { %v1414_v18 = vpop.f32.mrf.mxu1 }
 0x23e   :  { %v1041_v10 = vmax.f32 %v983_v15, 0.0 }
 0x23f   :  { %v987_v27 = vpop.f32.mrf.mxu1 }
 0x240   :  { %1067 = vst.msk [vmem:[%s2184_s9 + $0x78] sm:$0xff] %vm543_vm2, %v1041_v10  ;;  %v988_v26 = vadd.f32 %v2043_v19, %v987_v27 }
 0x241   :  { %v1417_v20 = vpop.f32.mrf.mxu1 }
 0x242   :  { %v1042_v21 = vmax.f32 %v988_v26, 0.0 }
 0x243   :  { %v990_v0 = vpop.f32.mrf.mxu1 }
 0x244   :  { %1068 = vst.msk [vmem:[%s2184_s9 + $0x80] sm:$0xff] %vm543_vm2, %v1042_v21  ;;  %v991_v34 = vadd.f32 %v2043_v19, %v990_v0 }
 0x245   :  { %v1418_v24 = vpop.f32.mrf.mxu1 }
 0x246   :  { %v1043_v25 = vmax.f32 %v991_v34, 0.0 }
 0x247   :  { %v995_v16 = vpop.f32.mrf.mxu1 }
 0x248   :  { %1069 = vst.msk [vmem:[%s2184_s9 + $0x88] sm:$0xff] %vm543_vm2, %v1043_v25  ;;  %v996_v32 = vadd.f32 %v2043_v19, %v995_v16 }
 0x249   :  { %v1421_v28 = vpop.f32.mrf.mxu1 }
 0x24a   :  { %v1044_v30 = vmax.f32 %v996_v32, 0.0 }
 0x24b   :  { %v998_v31 = vpop.f32.mrf.mxu1 }
 0x24c   :  { %1070 = vst.msk [vmem:[%s2184_s9 + $0x90] sm:$0xff] %vm543_vm2, %v1044_v30  ;;  %v999_v23 = vadd.f32 %v2043_v19, %v998_v31 }
 0x24d   :  { %v1422_v33 = vpop.f32.mrf.mxu1 }
 0x24e   :  { %v1045_v36 = vmax.f32 %v999_v23, 0.0 }
 0x24f   :  { %v1003_v37 = vpop.f32.mrf.mxu1 }
 0x250   :  { %1071 = vst.msk [vmem:[%s2184_s9 + $0x98] sm:$0xff] %vm543_vm2, %v1045_v36  ;;  %v1004_v38 = vadd.f32 %v2043_v19, %v1003_v37 }
 0x251   :  { %v1425_v39 = vpop.f32.mrf.mxu1 }
 0x252   :  { %v1046_v29 = vmax.f32 %v1004_v38, 0.0 }
 0x253   :  { %v1006_v40 = vpop.f32.mrf.mxu1 }
 0x254   :  { %1072 = vst.msk [vmem:[%s2184_s9 + $0xa0] sm:$0xff] %vm543_vm2, %v1046_v29  ;;  %v1007_v43 = vadd.f32 %v2043_v19, %v1006_v40 }
 0x255   :  { %v1426_v42 = vpop.f32.mrf.mxu1 }
 0x256   :  { %v1047_v44 = vmax.f32 %v1007_v43, 0.0 }
 0x257   :  { %v1011_v35 = vpop.f32.mrf.mxu1 }
 0x258   :  { %1073 = vst.msk [vmem:[%s2184_s9 + $0xa8] sm:$0xff] %vm543_vm2, %v1047_v44  ;;  %v1012_v45 = vadd.f32 %v2043_v19, %v1011_v35 }
 0x259   :  { %v1429_v46 = vpop.f32.mrf.mxu1 }
 0x25a   :  { %v1048_v49 = vmax.f32 %v1012_v45, 0.0 }
 0x25b   :  { %v1014_v50 = vpop.f32.mrf.mxu1 }
 0x25c   :  { %1074 = vst.msk [vmem:[%s2184_s9 + $0xb0] sm:$0xff] %vm543_vm2, %v1048_v49  ;;  %v1015_v47 = vadd.f32 %v2043_v19, %v1014_v50 }
 0x25d   :  { %v1430_v41 = vpop.f32.mrf.mxu1 }
 0x25e   :  { %v1049_v6 = vmax.f32 %v1015_v47, 0.0 }
 0x25f   :  { %v1019_v51 = vpop.f32.mrf.mxu1 }
 0x260   :  { %1075 = vst.msk [vmem:[%s2184_s9 + $0xb8] sm:$0xff] %vm543_vm2, %v1049_v6  ;;  %v1020_v53 = vadd.f32 %v2043_v19, %v1019_v51 }
 0x261   :  { %v1433_v55 = vpop.f32.mrf.mxu1 }
 0x262   :  { %v1050_v48 = vmax.f32 %v1020_v53, 0.0 }
 0x263   :  { %v1022_v52 = vpop.f32.mrf.mxu1 }
 0x264   :  { %1076 = vst.msk [vmem:[%s2184_s9 + $0xc0] sm:$0xff] %vm543_vm2, %v1050_v48  ;;  %v1023_v56 = vadd.f32 %v2043_v19, %v1022_v52 }
 0x265   :  { %v1434_v58 = vpop.f32.mrf.mxu1 }
 0x266   :  { %v1051_v12 = vmax.f32 %v1023_v56, 0.0 }
 0x268   :  { %1077 = vst.msk [vmem:[%s2184_s9 + $0xc8] sm:$0xff] %vm543_vm2, %v1051_v12 }

</bundles_post_ra>
